<compile_context>
chip_gen: v7x
topology: tpu7x:2x2x1
jax: 0.10.0
libtpu: 0.0.40
codegen_flags: <defaults>
</compile_context>

<pallas_src>
import functools

import jax
import jax.numpy as jnp
from jax.experimental import pallas as pl
from jax.experimental.pallas import tpu as pltpu

NACTIONS = 4
IN_FEATURES = 10
# Lane-axis tile.  Per tile: (10 + 4) * TILE_B * 4 B * 2 buffers ~ 0.23 MiB at
# TILE_B = 2048 — comfortably within the scoped VMEM default on v5e/v6e/v7x.
MAX_TILE_B = 2048


def _round_up(x, m):
    return ((x + m - 1) // m) * m


def policy_kernel(w_ref, b_ref, obs_ref, out_ref):
    # w_ref: (4, 10)  b_ref: (4, 1)  obs_ref: (10, TILE_B)  out_ref: (4, TILE_B)
    w = w_ref[...]
    b = b_ref[...]
    x = obs_ref[...]

    # logits^T = W @ obs^T + b  -> (4, TILE_B), batch on the lane axis.
    logits = jnp.dot(w, x, preferred_element_type=jnp.float32) + b

    # Softmax over the 4 actions (sublane axis), numerically stable.
    # Padded lanes of a partial batch tile compute garbage per-column values,
    # but columns are independent and Pallas never writes them past the array
    # extent, so valid columns are unaffected.
    m = jnp.max(logits, axis=0, keepdims=True)
    e = jnp.exp(logits - m)
    denom = jnp.sum(e, axis=0, keepdims=True)
    out_ref[...] = (e * pl.reciprocal(denom, approx=True)).astype(out_ref.dtype)


@functools.partial(jax.jit, static_argnames=("tile_b",))
def dummy_policy_forward(obs, weight, bias, *, tile_b=MAX_TILE_B):
    """obs: (B, 10) f32, weight: (4, 10) f32 (PyTorch layout), bias: (4,) f32."""
    B = obs.shape[0]
    obs_t = obs.T                          # (10, B): batch on the lane axis
    b2d = bias.reshape(NACTIONS, 1)        # (4, 1)

    tb = min(tile_b, _round_up(B, 128))    # lane-multiple tile, clamped to batch
    grid = (pl.cdiv(B, tb),)

    out_t = pl.pallas_call(
        policy_kernel,
        out_shape=jax.ShapeDtypeStruct((NACTIONS, B), jnp.float32),
        grid_spec=pltpu.PrefetchScalarGridSpec(
            num_scalar_prefetch=0,
            grid=grid,
            in_specs=[
                # weight / bias: constant block index -> resident across grid steps
                pl.BlockSpec((NACTIONS, IN_FEATURES), lambda i: (0, 0)),
                pl.BlockSpec((NACTIONS, 1), lambda i: (0, 0)),
                # obs tile: one lane-dense slab per grid step
                pl.BlockSpec((IN_FEATURES, tb), lambda i: (0, i)),
            ],
            out_specs=pl.BlockSpec((NACTIONS, tb), lambda i: (0, i)),
        ),
        compiler_params=pltpu.CompilerParams(
            dimension_semantics=("parallel",)),
    )(weight, b2d, obs_t)

    return out_t.T                         # (B, 4), same as linear(obs).softmax(1)


if __name__ == "__main__":
    key = jax.random.PRNGKey(0)
    k_obs, k_w, k_b = jax.random.split(key, 3)

    B = 2
    obs = jax.random.normal(k_obs, (B, IN_FEATURES), dtype=jnp.float32)

    # Deterministic parameters matching nn.Linear(10, 4) shapes:
    # weight: (out, in) = (4, 10), bias: (4,)  (uniform in +/- 1/sqrt(in)).
    bound = 1.0 / (IN_FEATURES ** 0.5)
    weight = jax.random.uniform(k_w, (NACTIONS, IN_FEATURES),
                                minval=-bound, maxval=bound, dtype=jnp.float32)
    bias = jax.random.uniform(k_b, (NACTIONS,),
                              minval=-bound, maxval=bound, dtype=jnp.float32)

    out = dummy_policy_forward(obs, weight, bias)
    out = jax.block_until_ready(out)

    # Sanity check against pure-JAX reference (approx reciprocal in the
    # denominator -> allow ~1e-3 tolerance).
    ref = jax.nn.softmax(obs @ weight.T + bias, axis=1)
    assert out.shape == (B, NACTIONS)
    assert jnp.allclose(out, ref, atol=2e-3, rtol=2e-3)
    assert jnp.allclose(jnp.sum(out, axis=1), 1.0, atol=2e-3)

    print("KERNEL_OK")
</pallas_src>

<mosaic_0001>
module attributes {stable_mosaic.version = 11 : i64} {
  func.func @policy_kernel(%arg0: i32, %arg1: memref<4x10xf32, #tpu.memory_space<vmem>>, %arg2: memref<4x1xf32, #tpu.memory_space<vmem>>, %arg3: memref<10x128xf32, #tpu.memory_space<vmem>>, %arg4: memref<4x128xf32, #tpu.memory_space<vmem>>) attributes {dimension_semantics = [#tpu.dimension_semantics<parallel>], iteration_bounds = array<i64: 1>, scalar_prefetch = 0 : i64, scratch_operands = 0 : i64, tpu.core_type = #tpu.core_type<tc>, window_params = [{pipeline_mode = #tpu.pipeline_mode<synchronous>, transform_indices = @transform_0, window_bounds = array<i64: 4, 10>}, {pipeline_mode = #tpu.pipeline_mode<synchronous>, transform_indices = @transform_1, window_bounds = array<i64: 4, 1>}, {transform_indices = @transform_2, window_bounds = array<i64: 10, 128>}, {transform_indices = @transform_3, window_bounds = array<i64: 4, 128>}]} {
    %c0 = arith.constant 0 : index
    %c0_0 = arith.constant 0 : index
    %0 = vector.load %arg1[%c0, %c0_0] : memref<4x10xf32, #tpu.memory_space<vmem>>, vector<4x10xf32>
    %c0_1 = arith.constant 0 : index
    %c0_2 = arith.constant 0 : index
    %1 = vector.load %arg2[%c0_1, %c0_2] : memref<4x1xf32, #tpu.memory_space<vmem>>, vector<4x1xf32>
    %c0_3 = arith.constant 0 : index
    %c0_4 = arith.constant 0 : index
    %2 = vector.load %arg3[%c0_3, %c0_4] : memref<10x128xf32, #tpu.memory_space<vmem>>, vector<10x128xf32>
    %cst = arith.constant dense<0.000000e+00> : vector<4x128xf32>
    %3 = tpu.matmul %0, %2, %cst {dimension_numbers = #tpu.dot_dimension_numbers<[1], [0], [0], [1], [0, 0, 1, 1], [], []>} : vector<4x10xf32>, vector<10x128xf32>, vector<4x128xf32> -> vector<4x128xf32>
    %4 = vector.broadcast %1 : vector<4x1xf32> to vector<4x128xf32>
    %5 = arith.addf %3, %4 : vector<4x128xf32>
    %cst_5 = arith.constant dense<0xFF800000> : vector<128xf32>
    %6 = vector.multi_reduction <maximumf>, %5, %cst_5 [0] : vector<4x128xf32> to vector<128xf32>
    %7 = vector.shape_cast %6 : vector<128xf32> to vector<1x128xf32>
    %8 = vector.broadcast %7 : vector<1x128xf32> to vector<4x128xf32>
    %9 = arith.subf %5, %8 : vector<4x128xf32>
    %10 = math.exp %9 : vector<4x128xf32>
    %cst_6 = arith.constant dense<0.000000e+00> : vector<128xf32>
    %11 = vector.multi_reduction <add>, %10, %cst_6 [0] : vector<4x128xf32> to vector<128xf32>
    %12 = vector.shape_cast %11 : vector<128xf32> to vector<1x128xf32>
    %13 = tpu.reciprocal %12 {approx = true} : vector<1x128xf32> -> vector<1x128xf32>
    %14 = vector.broadcast %13 : vector<1x128xf32> to vector<4x128xf32>
    %15 = arith.mulf %10, %14 : vector<4x128xf32>
    %c0_7 = arith.constant 0 : index
    %c0_8 = arith.constant 0 : index
    %16 = vector.load %arg4[%c0_7, %c0_8] : memref<4x128xf32, #tpu.memory_space<vmem>>, vector<4x128xf32>
    tpu.vector_store %arg4[%c0_7, %c0_8], %15 {strides = array<i32>} : memref<4x128xf32, #tpu.memory_space<vmem>>, vector<4x128xf32>,
    return
  }
  func.func @transform_0(%arg0: i32) -> (i32, i32) {
    %c0_i32 = arith.constant 0 : i32
    %c0_i32_0 = arith.constant 0 : i32
    %c0_i32_1 = arith.constant 0 : i32
    return %c0_i32, %c0_i32_0 : i32, i32
  }
  func.func @transform_1(%arg0: i32) -> (i32, i32) {
    %c0_i32 = arith.constant 0 : i32
    %c0_i32_0 = arith.constant 0 : i32
    %c0_i32_1 = arith.constant 0 : i32
    return %c0_i32, %c0_i32_0 : i32, i32
  }
  func.func @transform_2(%arg0: i32) -> (i32, i32) {
    %c0_i32 = arith.constant 0 : i32
    %c0_i32_0 = arith.constant 0 : i32
    return %c0_i32, %arg0 : i32, i32
  }
  func.func @transform_3(%arg0: i32) -> (i32, i32) {
    %c0_i32 = arith.constant 0 : i32
    %c0_i32_0 = arith.constant 0 : i32
    return %c0_i32, %arg0 : i32, i32
  }
}

</mosaic_0001>

<bundles_post_ra>
// kernel: dummy_policy_forward.1
= control target key start
LH: loop header
LB: loop body
LE: loop exit
PB: predicated region body
PF: predicated region fallthrough
CT: control target
= control target key end

     0   :  { %vm27_vm0 = vcmask 1041408   ;;  %v152_v0 = vmov 0.0|0.0   ;;  %vm153_vm1 = vmmov 1   ;;  %vm154_vm3 = vmmov 0   ;;  %s192_s2 = inlined_call_operand.vmem [shape: f32[10,2], index: 2, kind: input, shape index: {}]   ;;  %s193_s1 = inlined_call_operand.vmem [shape: f32[4,1], index: 1, kind: input, shape index: {}]   ;;  %s194_s0 = inlined_call_operand.vmem [shape: f32[4,10], index: 0, kind: input, shape index: {}]   ;;  %s195_s3 = inlined_call_operand.vmem [shape: f32[4,2], index: 3, kind: output, shape index: {}]  }
   0x1   :  { %138 = vmatprep.subr.bf16.mxu0 %v152_v0  ;;  %v16_v1 = vld [vmem:[%s192_s2] sm:$0xff]  ;;  %v17_v2 = vld [vmem:[%s192_s2 + $0x8] sm:$0x3]  ;;  %vm140_vm2 = vmpackc.low %vm27_vm0, %vm153_vm1  ;;  %v155_v4 = vmov 0.0   ;;  %v156_v5 = vmov 0   ;;  %vm23_vm4 = vcmask 80896  }
   0x2   :  { %v139_v3 = vpack.c.bf16 %v17_v2, %v16_v1  ;;  %135 = vmatprep.mubr.msk.f32.mxu0 %vm154_vm3, %v155_v4  ;;  %147 = vset.pattern.permute.xlu0 %v156_v5  ;;  %v15_v6 = vld [vmem:[%s193_s1] sm:$0xf]  ;;  %vm101_vm5 = vcmask 1043456  }
   0x3   :  { %20 = vperm.xlu0 %147, %v15_v6   ;;  %v14_v7 = vld [vmem:[%s194_s0] sm:$0xf] }
   0x4   :  { %141 = vmatpush3.bf16.msk.msra.mxu0 %vm140_vm2, %v139_v3 }
   0x7   :  { %136 = vmatmul.mubr.msk.f32.vlgmr.msra.gmra.mrb[0].mxu0 %vm23_vm4, %v14_v7 }
  0x82   :  { %v21_v8 = vpop.permute.xlu0 %20 }
  0xda   :  { %v97_v9 = vpop.f32.mrb[0].mxu0 }
  0xdb   :  { %v98_v10 = vadd.f32 %v97_v9, %v21_v8  ;;  %v137_v11 = vpop.f32.mrb[1].mxu0 }
  0xdd   :  { %v102_v12 = vsel %vm101_vm5, %v98_v10, -inf }
  0xde   :  { %v103_v13 = vrot.slane %v102_v12, 4 }
  0xe0   :  { %v104_v14 = vmax.f32 %v102_v12, %v103_v13 }
  0xe2   :  { %v105_v15 = vrot.slane %v104_v14, 2 }
  0xe4   :  { %v106_v16 = vmax.f32 %v104_v14, %v105_v15 }
  0xe6   :  { %v107_v17 = vrot.slane %v106_v16, 1 }
  0xe8   :  { %v108_v18 = vmax.f32 %v106_v16, %v107_v17 }
  0xea   :  { %v109_v19 = vsub.f32 %v98_v10, %v108_v18 }
  0xec   :  { %v110_v20 = vmul.f32 1.442695, %v109_v19 }
  0xee   :  { %148 = vpow2.f32 %v110_v20 }
  0xf8   :  { %v149_v21 = vpop.eup %148 }
  0xf9   :  { %v112_v22 = vsel %vm101_vm5, %v149_v21, 0.0 }
  0xfa   :  { %v113_v23 = vrot.slane %v112_v22, 4 }
  0xfc   :  { %v114_v24 = vadd.f32 %v113_v23, %v112_v22 }
  0xfe   :  { %v115_v25 = vrot.slane %v114_v24, 2 }
 0x100   :  { %v116_v26 = vadd.f32 %v115_v25, %v114_v24 }
 0x102   :  { %v117_v27 = vrot.slane %v116_v26, 1 }
 0x104   :  { %v118_v28 = vadd.f32 %v117_v27, %v116_v26 }
 0x106   :  { %150 = vrcp.f32 %v118_v28 }
 0x110   :  { %v151_v29 = vpop.eup %150 }
 0x111   :  { %v120_v30 = vmul.f32 %v151_v29, %v149_v21 }
 0x113   :  { %121 = vst [vmem:[%s195_s3] sm:$0xf] %v120_v30 }

</bundles_post_ra>
